<compile_context>
chip_gen: v6e
topology: v6e:2x2x1
jax: 0.10.0
libtpu: 0.0.40
codegen_flags: <defaults>
</compile_context>

<pallas_src>
import functools

import jax
import jax.numpy as jnp
from jax import lax
from jax.experimental import pallas as pl
from jax.experimental.pallas import tpu as pltpu

EPS_F = 1e-12
LANE = 128


def _stage1_kernel(gamma, qf_ref, x_ref, qs_ref, lf_ref, ls_ref, w_ref, acc_ref):
    """W[:, jtile] = R[:, jtile] * (Q_F^T @ sum_k X[:, kchunk] @ Q_S[kchunk, jtile])."""
    k = pl.program_id(1)

    @pl.when(k == 0)
    def _():
        acc_ref[...] = jnp.zeros_like(acc_ref)

    # (m, tk) @ (tk, tn) bf16 MXU matmul, f32 accumulation.
    acc_ref[...] += jnp.dot(x_ref[...], qs_ref[...],
                            preferred_element_type=jnp.float32)

    @pl.when(k == pl.num_programs(1) - 1)
    def _():
        # Q_F^T @ acc without materializing the transpose: contract axis 0 with axis 0.
        t = lax.dot_general(qf_ref[...], acc_ref[...].astype(jnp.bfloat16),
                            (((0,), (0,)), ((), ())),
                            preferred_element_type=jnp.float32)          # (m, tn)
        # R = 1 / (1 - gamma * lambda_F lambda_S^T), computed in-kernel (VPU, f32).
        r = 1.0 / (1.0 - gamma * lf_ref[...] * ls_ref[...])              # (m, tn)
        w_ref[...] = (r * t).astype(w_ref.dtype)


def _stage2_kernel(qf_ref, w_ref, qs_ref, bw_ref, out_ref, acc_ref):
    """out[jtile] = L2norm_cols(Q_F @ sum_k W[:, kchunk] @ Q_S[jtile, kchunk]^T)^T @ B^T."""
    k = pl.program_id(1)

    @pl.when(k == 0)
    def _():
        acc_ref[...] = jnp.zeros_like(acc_ref)

    # W[:, kchunk] @ Q_S[jtile, kchunk]^T : contract axis 1 with axis 1 (no .T copy).
    acc_ref[...] += lax.dot_general(w_ref[...], qs_ref[...],
                                    (((1,), (1,)), ((), ())),
                                    preferred_element_type=jnp.float32)  # (m, tn)

    @pl.when(k == pl.num_programs(1) - 1)
    def _():
        z = jnp.dot(qf_ref[...], acc_ref[...].astype(jnp.bfloat16),
                    preferred_element_type=jnp.float32)                  # (m, tn)
        # F.normalize(Z.t(), dim=-1): per-node (column) L2 norm, in column form.
        # z * rsqrt(max(||z||^2, 1e-24)) == z / max(||z||, 1e-12)  (EUP rsqrt, VPU mul)
        nrm = jnp.sum(z * z, axis=0, keepdims=True)                      # (1, tn)
        z = z * lax.rsqrt(jnp.maximum(nrm, 1e-24))
        # TODO(synk): F.dropout(p=0.5) is identity in eval mode; training-mode RNG
        # dropout (pltpu.prng_*) not implemented here.
        # (Z_norm)^T @ B.weight^T without transposing: contract feature axis 0 with 0.
        out_ref[...] = lax.dot_general(z.astype(jnp.bfloat16), bw_ref[...],
                                       (((0,), (0,)), ((), ())),
                                       preferred_element_type=jnp.float32)  # (tn, my_pad)


def eignn_linear_forward(x, f_param, b_weight, q_s, lambda_s, gamma,
                         *, tile_n=128, tile_k=128):
    """x: (m, n) f32; f_param: (m, m); b_weight: (m_y, m) (PyTorch layout)."""
    m, n = x.shape
    m_y = b_weight.shape[0]

    # --- glue: g(F) and its eigendecomposition (no Pallas equivalent for eigh) ---
    ff = f_param.T @ f_param
    g_f = ff / (jnp.linalg.norm(ff) + EPS_F)
    lambda_f, q_f = jnp.linalg.eigh(g_f)                 # (m,), (m, m)

    # --- padding: node dim to a lane multiple, class dim to a full (128) lane ---
    n_pad = ((n + LANE - 1) // LANE) * LANE
    pad_n = n_pad - n
    tn = min(tile_n, n_pad)
    tk = min(tile_k, n_pad)
    my_pad = ((m_y + LANE - 1) // LANE) * LANE           # lane-dense output stores

    x_p = jnp.pad(x, ((0, 0), (0, pad_n)))
    qs_p = jnp.pad(q_s, ((0, pad_n), (0, pad_n)))
    ls_p = jnp.pad(lambda_s, (0, pad_n))
    bw_p = jnp.pad(b_weight.T, ((0, 0), (0, my_pad - m_y)))

    # --- bf16 MXU operands, f32 elementwise / accumulation ---
    qf_bf = q_f.astype(jnp.bfloat16)
    x_bf = x_p.astype(jnp.bfloat16)
    qs_bf = qs_p.astype(jnp.bfloat16)
    bw_bf = bw_p.astype(jnp.bfloat16)
    lf2 = lambda_f.reshape(m, 1).astype(jnp.float32)
    ls2 = ls_p.reshape(1, n_pad).astype(jnp.float32)

    grid = (n_pad // tn, n_pad // tk)  # (node tiles: parallel, contraction chunks: arbitrary)

    def _vmem_limit(block_bytes, scratch_bytes):
        need = 2 * sum(block_bytes) + scratch_bytes      # double-buffered DMA blocks
        return int(min(2 * need + (8 << 20), 64 << 20))  # headroom, cap for v7x (64 MiB)

    # ---------------- stage 1: W = R * (Q_F^T @ X @ Q_S) ----------------
    s1_blocks = [m * m * 2, m * tk * 2, tk * tn * 2, m * 4, tn * 4, m * tn * 2]
    w = pl.pallas_call(
        functools.partial(_stage1_kernel, float(gamma)),
        out_shape=jax.ShapeDtypeStruct((m, n_pad), jnp.bfloat16),
        grid_spec=pltpu.PrefetchScalarGridSpec(
            num_scalar_prefetch=0,
            grid=grid,
            in_specs=[
                pl.BlockSpec((m, m), lambda j, k: (0, 0)),       # Q_F
                pl.BlockSpec((m, tk), lambda j, k: (0, k)),      # X chunk
                pl.BlockSpec((tk, tn), lambda j, k: (k, j)),     # Q_S slab
                pl.BlockSpec((m, 1), lambda j, k: (0, 0)),       # lambda_F
                pl.BlockSpec((1, tn), lambda j, k: (0, j)),      # lambda_S tile
            ],
            out_specs=pl.BlockSpec((m, tn), lambda j, k: (0, j)),
            scratch_shapes=[pltpu.VMEM((m, tn), jnp.float32)],
        ),
        compiler_params=pltpu.CompilerParams(
            dimension_semantics=("parallel", "arbitrary"),
            vmem_limit_bytes=_vmem_limit(s1_blocks, m * tn * 4),
        ),
    )(qf_bf, x_bf, qs_bf, lf2, ls2)

    # -------- stage 2: out = normalize_cols(Q_F @ W @ Q_S^T)^T @ B^T --------
    s2_blocks = [m * m * 2, m * tk * 2, tn * tk * 2, m * my_pad * 2, tn * my_pad * 4]
    out_p = pl.pallas_call(
        _stage2_kernel,
        out_shape=jax.ShapeDtypeStruct((n_pad, my_pad), jnp.float32),
        grid_spec=pltpu.PrefetchScalarGridSpec(
            num_scalar_prefetch=0,
            grid=grid,
            in_specs=[
                pl.BlockSpec((m, m), lambda j, k: (0, 0)),       # Q_F
                pl.BlockSpec((m, tk), lambda j, k: (0, k)),      # W chunk
                pl.BlockSpec((tn, tk), lambda j, k: (j, k)),     # Q_S rows of node tile
                pl.BlockSpec((m, my_pad), lambda j, k: (0, 0)),  # B.weight^T (padded)
            ],
            out_specs=pl.BlockSpec((tn, my_pad), lambda j, k: (j, 0)),
            scratch_shapes=[pltpu.VMEM((m, tn), jnp.float32)],
        ),
        compiler_params=pltpu.CompilerParams(
            dimension_semantics=("parallel", "arbitrary"),
            vmem_limit_bytes=_vmem_limit(s2_blocks, m * tn * 4),
        ),
    )(qf_bf, w, qs_bf, bw_bf)

    return out_p[:n, :m_y]


if __name__ == "__main__":
    # small shapes consistent with the module: m features, n nodes, m_y classes
    m, n, m_y = 32, 256, 8
    gamma = 0.8

    key = jax.random.PRNGKey(0)
    k_x, k_f, k_b = jax.random.split(key, 3)

    # chain (path) graph adjacency, symmetrically normalized: S = D^-1/2 A D^-1/2
    a = jnp.zeros((n, n), jnp.float32)
    idx = jnp.arange(n - 1)
    a = a.at[idx, idx + 1].set(1.0)
    a = a.at[idx + 1, idx].set(1.0)
    dinv = 1.0 / jnp.sqrt(a.sum(axis=1))
    s = a * dinv[:, None] * dinv[None, :]
    lambda_s, q_s = jnp.linalg.eigh(s)       # full eigendecomposition (num_eigenvec = n)

    # deterministic parameter init (shapes from __init__)
    x = jax.random.normal(k_x, (m, n), jnp.float32)
    bound_f = (6.0 / (m + m)) ** 0.5         # xavier_uniform_ for IDM_SGC.F (m, m)
    f_param = jax.random.uniform(k_f, (m, m), jnp.float32, -bound_f, bound_f)
    bound_b = 1.0 / (m ** 0.5)               # nn.Linear default reset for B.weight (m_y, m)
    b_weight = jax.random.uniform(k_b, (m_y, m), jnp.float32, -bound_b, bound_b)

    out = jax.block_until_ready(
        eignn_linear_forward(x, f_param, b_weight, q_s, lambda_s, gamma)
    )

    # pure-JAX f32 reference for sanity
    ff = f_param.T @ f_param
    g_f = ff / (jnp.linalg.norm(ff) + EPS_F)
    lam_f, q_f = jnp.linalg.eigh(g_f)
    r = 1.0 / (1.0 - gamma * lam_f[:, None] * lambda_s[None, :])
    z = q_f @ (r * (q_f.T @ x @ q_s)) @ q_s.T
    zt = z.T
    zt = zt / jnp.maximum(jnp.linalg.norm(zt, axis=-1, keepdims=True), 1e-12)
    ref = zt @ b_weight.T

    assert out.shape == (n, m_y)
    max_err = float(jnp.max(jnp.abs(out - ref)))
    assert jnp.allclose(out, ref, rtol=3e-2, atol=3e-2), f"max abs err {max_err}"
    print("KERNEL_OK")
</pallas_src>

<mosaic_0001>
module attributes {stable_mosaic.version = 11 : i64} {
  func.func @_stage1_kernel(%arg0: i32, %arg1: i32, %arg2: memref<32x32xbf16, #tpu.memory_space<vmem>>, %arg3: memref<32x128xbf16, #tpu.memory_space<vmem>>, %arg4: memref<128x128xbf16, #tpu.memory_space<vmem>>, %arg5: memref<32x1xf32, #tpu.memory_space<vmem>>, %arg6: memref<1x128xf32, #tpu.memory_space<vmem>>, %arg7: memref<32x128xbf16, #tpu.memory_space<vmem>>, %arg8: memref<32x128xf32, #tpu.memory_space<vmem>>) attributes {dimension_semantics = [#tpu.dimension_semantics<parallel>, #tpu.dimension_semantics<arbitrary>], iteration_bounds = array<i64: 2, 2>, scalar_prefetch = 0 : i64, scratch_operands = 1 : i64, tpu.core_type = #tpu.core_type<tc>, window_params = [{pipeline_mode = #tpu.pipeline_mode<synchronous>, transform_indices = @transform_0, window_bounds = array<i64: 32, 32>}, {transform_indices = @transform_1, window_bounds = array<i64: 32, 128>}, {transform_indices = @transform_2, window_bounds = array<i64: 128, 128>}, {pipeline_mode = #tpu.pipeline_mode<synchronous>, transform_indices = @transform_3, window_bounds = array<i64: 32, 1>}, {transform_indices = @transform_4, window_bounds = array<i64: 1, 128>}, {transform_indices = @transform_5, window_bounds = array<i64: 32, 128>}]} {
    %c0_i32 = arith.constant 0 : i32
    %0 = arith.cmpi eq, %arg1, %c0_i32 : i32
    %1 = arith.extui %0 : i1 to i32
    %c0_i32_0 = arith.constant 0 : i32
    %2 = arith.cmpi ne, %1, %c0_i32_0 : i32
    scf.if %2 {
      %cst_9 = arith.constant 0.000000e+00 : f32
      %12 = vector.broadcast %cst_9 : f32 to vector<32x128xf32>
      %c0_10 = arith.constant 0 : index
      %c0_11 = arith.constant 0 : index
      %13 = vector.load %arg8[%c0_10, %c0_11] : memref<32x128xf32, #tpu.memory_space<vmem>>, vector<32x128xf32>
      tpu.vector_store %arg8[%c0_10, %c0_11], %12 {strides = array<i32>} : memref<32x128xf32, #tpu.memory_space<vmem>>, vector<32x128xf32>,
    } else {
    }
    %c0 = arith.constant 0 : index
    %c0_1 = arith.constant 0 : index
    %3 = vector.load %arg8[%c0, %c0_1] : memref<32x128xf32, #tpu.memory_space<vmem>>, vector<32x128xf32>
    %c0_2 = arith.constant 0 : index
    %c0_3 = arith.constant 0 : index
    %4 = vector.load %arg3[%c0_2, %c0_3] : memref<32x128xbf16, #tpu.memory_space<vmem>>, vector<32x128xbf16>
    %c0_4 = arith.constant 0 : index
    %c0_5 = arith.constant 0 : index
    %5 = vector.load %arg4[%c0_4, %c0_5] : memref<128x128xbf16, #tpu.memory_space<vmem>>, vector<128x128xbf16>
    %cst = arith.constant dense<0.000000e+00> : vector<32x128xf32>
    %6 = tpu.matmul %4, %5, %cst {dimension_numbers = #tpu.dot_dimension_numbers<[1], [0], [0], [1], [0, 0, 1, 1], [], []>} : vector<32x128xbf16>, vector<128x128xbf16>, vector<32x128xf32> -> vector<32x128xf32>
    %7 = arith.addf %3, %6 : vector<32x128xf32>
    %c0_6 = arith.constant 0 : index
    %c0_7 = arith.constant 0 : index
    %8 = vector.load %arg8[%c0_6, %c0_7] : memref<32x128xf32, #tpu.memory_space<vmem>>, vector<32x128xf32>
    tpu.vector_store %arg8[%c0_6, %c0_7], %7 {strides = array<i32>} : memref<32x128xf32, #tpu.memory_space<vmem>>, vector<32x128xf32>,
    %c1_i32 = arith.constant 1 : i32
    %9 = arith.cmpi eq, %arg1, %c1_i32 : i32
    %10 = arith.extui %9 : i1 to i32
    %c0_i32_8 = arith.constant 0 : i32
    %11 = arith.cmpi ne, %10, %c0_i32_8 : i32
    scf.if %11 {
      %c0_9 = arith.constant 0 : index
      %c0_10 = arith.constant 0 : index
      %12 = vector.load %arg2[%c0_9, %c0_10] : memref<32x32xbf16, #tpu.memory_space<vmem>>, vector<32x32xbf16>
      %c0_11 = arith.constant 0 : index
      %c0_12 = arith.constant 0 : index
      %13 = vector.load %arg8[%c0_11, %c0_12] : memref<32x128xf32, #tpu.memory_space<vmem>>, vector<32x128xf32>
      %14 = arith.truncf %13 : vector<32x128xf32> to vector<32x128xbf16>
      %cst_13 = arith.constant dense<0.000000e+00> : vector<32x128xf32>
      %15 = tpu.matmul %12, %14, %cst_13 {dimension_numbers = #tpu.dot_dimension_numbers<[0], [0], [1], [1], [0, 1, 1, 1], [], []>} : vector<32x32xbf16>, vector<32x128xbf16>, vector<32x128xf32> -> vector<32x128xf32>
      %c0_14 = arith.constant 0 : index
      %c0_15 = arith.constant 0 : index
      %16 = vector.load %arg5[%c0_14, %c0_15] : memref<32x1xf32, #tpu.memory_space<vmem>>, vector<32x1xf32>
      %cst_16 = arith.constant 8.000000e-01 : f32
      %17 = vector.broadcast %cst_16 : f32 to vector<32x1xf32>
      %18 = arith.mulf %17, %16 : vector<32x1xf32>
      %c0_17 = arith.constant 0 : index
      %c0_18 = arith.constant 0 : index
      %19 = vector.load %arg6[%c0_17, %c0_18] : memref<1x128xf32, #tpu.memory_space<vmem>>, vector<1x128xf32>
      %20 = vector.broadcast %18 : vector<32x1xf32> to vector<32x128xf32>
      %21 = vector.broadcast %19 : vector<1x128xf32> to vector<32x128xf32>
      %22 = arith.mulf %20, %21 : vector<32x128xf32>
      %cst_19 = arith.constant 1.000000e+00 : f32
      %23 = vector.broadcast %cst_19 : f32 to vector<32x128xf32>
      %24 = arith.subf %23, %22 : vector<32x128xf32>
      %cst_20 = arith.constant 1.000000e+00 : f32
      %25 = vector.broadcast %cst_20 : f32 to vector<32x128xf32>
      %26 = arith.divf %25, %24 : vector<32x128xf32>
      %27 = arith.mulf %26, %15 : vector<32x128xf32>
      %28 = arith.truncf %27 : vector<32x128xf32> to vector<32x128xbf16>
      %c0_21 = arith.constant 0 : index
      %c0_22 = arith.constant 0 : index
      %29 = vector.load %arg7[%c0_21, %c0_22] : memref<32x128xbf16, #tpu.memory_space<vmem>>, vector<32x128xbf16>
      tpu.vector_store %arg7[%c0_21, %c0_22], %28 {strides = array<i32>} : memref<32x128xbf16, #tpu.memory_space<vmem>>, vector<32x128xbf16>,
    } else {
    }
    return
  }
  func.func @transform_0(%arg0: i32, %arg1: i32) -> (i32, i32) {
    %c0_i32 = arith.constant 0 : i32
    %c0_i32_0 = arith.constant 0 : i32
    %c0_i32_1 = arith.constant 0 : i32
    return %c0_i32, %c0_i32_0 : i32, i32
  }
  func.func @transform_1(%arg0: i32, %arg1: i32) -> (i32, i32) {
    %c0_i32 = arith.constant 0 : i32
    %c0_i32_0 = arith.constant 0 : i32
    return %c0_i32, %arg1 : i32, i32
  }
  func.func @transform_2(%arg0: i32, %arg1: i32) -> (i32, i32) {
    %c0_i32 = arith.constant 0 : i32
    return %arg1, %arg0 : i32, i32
  }
  func.func @transform_3(%arg0: i32, %arg1: i32) -> (i32, i32) {
    %c0_i32 = arith.constant 0 : i32
    %c0_i32_0 = arith.constant 0 : i32
    %c0_i32_1 = arith.constant 0 : i32
    return %c0_i32, %c0_i32_0 : i32, i32
  }
  func.func @transform_4(%arg0: i32, %arg1: i32) -> (i32, i32) {
    %c0_i32 = arith.constant 0 : i32
    %c0_i32_0 = arith.constant 0 : i32
    return %c0_i32, %arg0 : i32, i32
  }
  func.func @transform_5(%arg0: i32, %arg1: i32) -> (i32, i32) {
    %c0_i32 = arith.constant 0 : i32
    %c0_i32_0 = arith.constant 0 : i32
    return %c0_i32, %arg0 : i32, i32
  }
}

</mosaic_0001>

<bundles_post_ra>
// kernel: tpu_custom_call.1
= control target key start
LH: loop header
LB: loop body
LE: loop exit
PB: predicated region body
PF: predicated region fallthrough
CT: control target
= control target key end

     0   :  { %s1627_s0 = inlined_call_operand.hbm [shape: bf16[32,32], index: 0, kind: input, shape index: {}]   ;;  %s1628_s1 = inlined_call_operand.vmem [shape: bf16[32,256], index: 1, kind: input, shape index: {}]   ;;  %s1629_s2 = inlined_call_operand.hbm [shape: bf16[256,256], index: 2, kind: input, shape index: {}]   ;;  %s1630_s3 = inlined_call_operand.vmem [shape: f32[32,1], index: 3, kind: input, shape index: {}]   ;;  %s1631_s4 = inlined_call_operand.vmem [shape: f32[1,256], index: 4, kind: input, shape index: {}]   ;;  %s1632_s5 = inlined_call_operand.hbm [shape: bf16[32,256], index: 5, kind: output, shape index: {}]  }
   0x1   :  { %1645 = sst [smem:[#allocation22_spill]] %s1627_s0 }
   0x2   :  { %1646 = sst [smem:[#allocation23_spill]] %s1628_s1 }
   0x3   :  { %1647 = sst [smem:[#allocation24_spill]] %s1630_s3 }
   0x4   :  { %1648 = sst [smem:[#allocation25_spill]] %s1632_s5 }
   0x5   :  { %10 = vsyncpa [#allocation4], 0 }
   0x6   :  { %11 = vsyncpa [#allocation8], 0 }
   0x7   :  { %13 = vsyncpa [#allocation8 + $0x1], 0 }
   0x8   :  { %14 = vsyncpa [#allocation5], 0 }
   0x9   :  { %16 = vsyncpa [#allocation5 + $0x1], 0  ;;  %s1317_s18 = smov 0   ;;  %s1319_s19 = smov 0  }
   0xa   :  { %s1321_s20 = smov 0   ;;  %s1323_s21 = smov 0  }
   0xb   :  { %s1325_s22 = smov 0   ;;  %s1327_s23 = smov 0  }
   0xc   :  { %s1329_s24 = smov 0   ;;  %s1331_s25 = smov 0  }
   0xd   :  { %s1333_s26 = smov 0   ;;  %s1335_s27 = smov 0  }
   0xe   :  { %s1337_s28 = smov 0   ;;  %s1339_s29 = smov 0  }
   0xf   :  { %s1341_s30 = smov 0  }
  0x10 LB: > { %1649 = sst [smem:[#allocation13_spill]] %s1224_s18  ;;  %s825_s6 = sadd.s32 4294967295, %s1272_s30   ;;  %s1272_s30 = sphi %s1341_s30, %s22_s30   ;;  %s1268_s29 = sphi %s1339_s29, %s1695_s29   ;;  %s1264_s28 = sphi %s1337_s28, %s1694_s28   ;;  %s1260_s27 = sphi %s1335_s27, %s1693_s27   ;;  %s1256_s26 = sphi %s1333_s26, %s1692_s26   ;;  %s1252_s25 = sphi %s1331_s25, %s1691_s25   ;;  %s1248_s24 = sphi %s1329_s24, %s1690_s24   ;;  %s1244_s23 = sphi %s1327_s23, %s1689_s23   ;;  %s1240_s22 = sphi %s1325_s22, %s1688_s22   ;;  %s1236_s21 = sphi %s1323_s21, %s1687_s21   ;;  %s1232_s20 = sphi %s1321_s20, %s1679_s20   ;;  %s1228_s19 = sphi %s1319_s19, %s1686_s19   ;;  %s1224_s18 = sphi %s1317_s18, %s1685_s18  }
  0x11   : > { %1650 = sst [smem:[#allocation14_spill]] %s1232_s20  ;;  %s31_s8 = sadd.s32 1, %s1264_s28 }
  0x12   : > { %s34_s9 = sadd.s32 1, %s1268_s29  ;;  %p32_p0 = scmp.ge.s32.totalorder %s31_s8, 2 }
  0x13   : > { %s62_s10 = sadd.s32 1, %s1252_s25  ;;  %p69_p1 = scmp.ne.s32.totalorder %s1252_s25, %s1248_s24 }
  0x14   : > { %p70_p2 = scmp.eq.s32.totalorder %s1272_s30, 0  ;;  %s1697_s8 = smov (%p32_p0, %s31_s8), 0 }
  0x15   : > { %1651 = sst [smem:[#allocation15_spill]] %s1697_s8  ;;  %s1699_s9 = smov (!%p32_p0, %s34_s9), %s1268_s29 }
  0x16   : > { %s59_s11 = ssub.s32 %s1264_s28, %s1697_s8  ;;  %p1395_p3 = por %p70_p2, %p69_p1 }
  0x17   : > { %p36_p4 = scmp.ge.s32.totalorder %s1699_s9, 2  ;;  %p60_p5 = scmp.eq.s32.totalorder %s59_s11, 0 }
  0x18   : > { %s90_s13 = sadd.s32 1, %s1244_s23  ;;  %p97_p6 = scmp.ne.s32.totalorder %s1244_s23, %s1240_s22 }
  0x19   : > { %s1701_s9 = smov (%p36_p4, %s1699_s9), 0  ;;  %p103_p8 = scmp.ne.s32.totalorder %s1240_s22, %s1236_s21 }
  0x1a   : > { %1653 = sst [smem:[#allocation16_spill]] %s1701_s9  ;;  %s86_s15 = ssub.s32 %s1268_s29, %s1701_s9 }
  0x1b   : > { %s1405_s14 = scalar_select %p60_p5, %s1252_s25, %s62_s10  }
  0x1c   : > { %p1409_p7 = por %p97_p6, %p70_p2  ;;  %s87_s17 = sor.u32 %s86_s15, %s59_s11 }
  0x1d   : > { %1654 = sst [smem:[#allocation17_spill]] %s1405_s14  ;;  %p88_p9 = scmp.eq.s32.totalorder %s87_s17, 0 }
  0x1e   : > { %s1655_s16 = scalar_select %p1409_p7, 1, 0 }
  0x1f   : > { %p1417_p10 = scmp.eq.s32.totalorder %s825_s6, 0  ;;  %p161_p11 = scmp.eq.s32.totalorder %s86_s15, 0 }
  0x20   : > { %s163_s8 = sadd.s32 1, %s1232_s20  ;;  %p173_p13 = scmp.ne.s32.totalorder %s1232_s20, %s1228_s19 }
  0x21   : > { %s1423_s10 = scalar_select %p88_p9, %s1244_s23, %s90_s13  }
  0x22   : > { %p1427_p12 = por %p1417_p10, %p103_p8  ;;  %p174_p0 = scmp.eq.s32.totalorder %s825_s6, 3 }
  0x23   : > { %1657 = sst [smem:[#allocation18_spill]] %s1423_s10  ;;  %p179_p1 = scmp.ne.s32.totalorder %s1228_s19, %s1224_s18 }
  0x24   : > { %s1658_s9 = scalar_select %p1427_p12, 1, 0 }
  0x25   : > { %s1434_s11 = scalar_select %p161_p11, %s1232_s20, %s163_s8  }
  0x26   : > { %s1660_s21 = sadd.s32 4294967294, %s1272_s30   ;;  %p827_p4 = scmp.ge.s32.totalorder %s1272_s30, 1 }
  0x27   : > { %1659 = sst [smem:[#allocation19_spill]] %s1434_s11  ;;  %p180_p2 = scmp.eq.s32.totalorder %s1660_s21, 3 }
  0x28   : > { %p1443_p5 = por %p174_p0, %p173_p13  ;;  %p187_p6 = scmp.lt.s32.totalorder %s1272_s30, 5 }
  0x29   : > { %p1448_p9 = por %p180_p2, %p179_p1  ;;  %s1274_s8 = smov [#allocation3]  }
  0x2a   : > { %s1661_s15 = scalar_select %p1443_p5, 1, 0 }
  0x2b   : > { %s1663_s13 = scalar_select %p1448_p9, 1, 0 }
  0x2c   : > { %1662 = sst [smem:[#allocation20_spill]] %s1661_s15  ;;  %p1452_p8 = pnand %p827_p4, %p187_p6 }
  0x2d   : > { %1664 = sst [smem:[#allocation21_spill]] %s1663_s13  ;;  %s199_s6 = sshll.u32 %s1274_s8, 4  ;;  %s200_s6 = int_to_ptr.vmem [resolvable:$true] %s199_s6 }
  0x2e   : > { %p932_p11 = pneg %p1452_p8  ;;  %s1091_s21 = scalar_lea.vmem %s200_s6, 256 }
  0x2f   : > { %p1092_p5 = scmp.ne.s32.totalorder %s200_s6, %s1091_s21  ;;  %p1099_p2 = scmp.lt.s32.totalorder %s200_s6, %s200_s6 }
  0x30   : > { %p933_p13 = pnand %p932_p11, %p1417_p10  ;;  %p1100_p7 = scmp.lt.s32.totalorder %s1091_s21, %s1091_s21 }
  0x32   : > { %p1082_p0 = pneg %p933_p13  ;;  %p1101_p9 = por %p1100_p7, %p1099_p2 }
  0x34   : > { %p1094_p12 = pnand %p1092_p5, %p1082_p0 }
  0x36   : > { %p1095_p1 = pneg %p1094_p12 }
  0x38   : > { %p1102_p4 = pnand %p1101_p9, %p1095_p1 }
  0x3a   : > { %1105 = shalt.err (!%p1102_p4)
}
  0x3b   : > { %s1275_s14 = smov 64   ;;  %s1276_s10 = smov 4  }
  0x3c   : > { %s1666_s0 = sld [smem:[#allocation22_spill]]  ;;  %p829_p6 = scmp.ge.s32.totalorder %s1272_s30, 4 }
  0x3e   : > { %212 = sbr.rel (%p829_p6) target bundleno = 98 (0x62), region = 24 }
  0x42   : > { %935 = dma.hbm_to_vmem [thread:$0]  (!%p933_p13), %s1666_s0, 256, %s200_s6, [#allocation4], %s1275_s14, %s1275_s14, %s1276_s10  }
  0x43   : > { %215 = sbr.rel (!%p1395_p3) target bundleno = 79 (0x4f), region = 28  ;;  %s217_s8 = sand.u32 (%p1395_p3), 1, %s1252_s25  }
  0x44   : > { %s831_s13 = sshll.u32 (%p1395_p3), %s1264_s28, 2  ;;  %s830_s21 = sshll.u32 (%p1395_p3), %s217_s8, 4 }
  0x45   : > { %s1667_s1 = sld [smem:[#allocation23_spill]] (%p1395_p3)  ;;  %s219_s3 = scalar_lea.vmem (%p1395_p3), [#allocation6], %s830_s21 }
  0x4b   : > { %s221_s15 = scalar_lea.vmem %s1667_s1, %s831_s13 }
  0x4c   : > { %v238_v0 = vld [vmem:[%s221_s15] sm:$0xf]  ;;  %v240_v1 = vld [vmem:[%s221_s15 + $0x8] sm:$0xf]  ;;  %v242_v2 = vld [vmem:[%s221_s15 + $0x10] sm:$0xf] }
  0x4d   : > { %239 = vst [vmem:[%s219_s3] sm:$0xf] %v238_v0  ;;  %241 = vst [vmem:[%s219_s3 + $0x4] sm:$0xf] %v240_v1  ;;  %v244_v3 = vld [vmem:[%s221_s15 + $0x18] sm:$0xf] }
  0x4e   : > { %243 = vst [vmem:[%s219_s3 + $0x8] sm:$0xf] %v242_v2  ;;  %245 = vst [vmem:[%s219_s3 + $0xc] sm:$0xf] %v244_v3 }
  0x4f PF: > { %s278_s20 = sand.u32 1, %s1244_s23   ;;  %s866_s12 = sshll.u32 %s1264_s28, 5 }
  0x50   : > { %s832_s14 = sshll.u32 %s278_s20, 6  ;;  %s288_s10 = sadd.s32 %s1268_s29, %s866_s12 }
  0x51   : > { %s835_s5 = sshll.u32 %s288_s10, 6  ;;  %s282_s18 = scalar_lea.vmem [#allocation7], %s832_s14 }
  0x52   : > { %s291_s11 = sshll.u32 %s282_s18, 4  ;;  %s290_s8 = scalar_lea.hbm %s1629_s2, %s835_s5  ;;  %s292_s11 = int_to_ptr.vmem [resolvable:$true] %s291_s11 }
  0x53   : > { %s279_s15 = scalar_lea.sflag [#allocation8], %s278_s20  ;;  %s1118_s21 = scalar_lea.vmem %s292_s11, 1024 }
  0x54   : > { %p1119_p3 = scmp.ne.s32.totalorder %s292_s11, %s1118_s21  ;;  %p1668_p7 = scmp.ne.s32.totalorder %s1655_s16, 0 }
  0x55   : > { %s1277_s3 = smov [#allocation7]  }
  0x56   : > { %p1120_p12 = pnand %p1119_p3, %p1668_p7  ;;  %s1122_s0 = sshll.u32 %s1277_s3, 4  ;;  %s1123_s0 = int_to_ptr.vmem [resolvable:$false] %s1122_s0 }
  0x57   : > { %s1124_s1 = scalar_lea.vmem %s1123_s0, 2048  ;;  %p1125_p9 = scmp.lt.s32.totalorder %s292_s11, %s1123_s0 }
  0x58   : > { %p1121_p5 = pneg %p1120_p12  ;;  %p1126_p11 = scmp.lt.s32.totalorder %s1124_s1, %s1118_s21 }
  0x5a   : > { %p1127_p13 = por %p1126_p11, %p1125_p9 }
  0x5c   : > { %p1128_p0 = pnand %p1127_p13, %p1121_p5 }
  0x5e   : > { %1131 = shalt.err (!%p1128_p0)
}
  0x5f   : > { %s1278_s12 = smov 128   ;;  %s1279_s14 = smov 64  }
  0x60   : > { %s1280_s10 = smov 4  }
  0x61   : > { %926 = dma.hbm_to_vmem [thread:$0]  (%p1668_p7), %s290_s8, 1024, %s292_s11, %s279_s15, %s1278_s12, %s1279_s14, %s1280_s10  }
  0x62 PF: > { %309 = sbr.rel (%p1452_p8) target bundleno = 692 (0x2b4), region = 77 }
  0x67   : > { %1211 = dma.done.wait (%p1417_p10), [#allocation4], 256  }
  0x68   : > { %1213 = vsyncadd (%p1417_p10), [#allocation4], 4294967040  ;;  %s316_s0 = sand.u32 1, %s1248_s24   ;;  %s322_s1 = sand.u32 1, %s1240_s22  }
  0x69   : > { %s1489_s20 = sshll.u32 %s316_s0, 4  ;;  %s839_s16 = sshll.u32 %s322_s1, 6 }
  0x6a   : > { %s318_s5 = scalar_lea.vmem [#allocation6], %s1489_s20  ;;  %s323_s18 = scalar_lea.sflag [#allocation8], %s322_s1 }
  0x6b   : > { %s1492_s11 = scalar_lea.vmem [#allocation7], %s839_s16  ;;  %p1669_p8 = scmp.ne.s32.totalorder %s1658_s9, 0 }
  0x6d   : > { %1215 = dma.done.wait (%p1669_p8), %s323_s18, 1024  }
  0x6e   : > { %1217 = vsyncadd (%p1669_p8), %s323_s18, 4294966272  ;;  %s357_s7 = sand.u32 1, %s1228_s19   ;;  %p361_p10 = scmp.lt.s32.totalorder %s1260_s27, 1 }
  0x6f   : > { %s840_s24 = sshll.u32 %s357_s7, 4  ;;  %p841_p1 = scmp.ne.s32.totalorder %s1256_s26, 0 }
  0x70   : > { %s1503_s17 = scalar_select %p361_p10, %s1260_s27, 1 }
  0x71   : > { %s1509_s15 = scalar_lea.vmem [#allocation9], %s840_s24  ;;  %368 = sbr.rel (%p841_p1) target bundleno = 121 (0x79), region = 93 }
  0x72   : > { %s363_s8 = scalar_lea.vmem %s1631_s4, %s1503_s17 }
  0x76   : > { %v1281_v4 = vmov 0.0  }
  0x77   : > { %369 = vst [vmem:[#allocation2 + $0x10] sm:$0xff] %v1281_v4  ;;  %370 = vst [vmem:[#allocation2] sm:$0xff] %v1281_v4 }
  0x78   : > { %371 = vst [vmem:[#allocation2 + $0x18] sm:$0xff] %v1281_v4  ;;  %372 = vst [vmem:[#allocation2 + $0x8] sm:$0xff] %v1281_v4 }
  0x79 PF: > { %v1058_v5 = vld [vmem:[%s1492_s11 + $0x38] sm:$0xff]   ;;  %v1059_v6 = vld [vmem:[%s1492_s11 + $0x30] sm:$0xff]   ;;  %v1060_v7 = vld [vmem:[%s1492_s11 + $0x28] sm:$0xff]   ;;  %p852_p2 = scmp.ne.s32.totalorder %s1256_s26, 1 }
  0x7a   : > { %896 = vmatprep.subr.bf16.mxu0 %v1058_v5  ;;  %v1061_v8 = vld [vmem:[%s1492_s11 + $0x20] sm:$0xff]   ;;  %v1062_v10 = vld [vmem:[%s1492_s11 + $0x18] sm:$0xff]   ;;  %v1063_v11 = vld [vmem:[%s1492_s11 + $0x10] sm:$0xff]   ;;  %s1670_s3 = sld [smem:[#allocation24_spill]] (!%p852_p2) }
  0x7b   : > { %897 = vmatpush3.bf16.msra.mxu0 %v1058_v5  ;;  %v1066_v9 = vld [vmem:[%s318_s5] sm:$0xff]   ;;  %v1064_v12 = vld [vmem:[%s1492_s11 + $0x8] sm:$0xff]  }
  0x7c   : > { %898 = vmatprep.subr.bf16.mxu0 %v1059_v6  ;;  %912 = vmatprep.mubr.bf16.mxu0 %v1066_v9  ;;  %v1065_v13 = vld [vmem:[%s1492_s11] sm:$0xff]   ;;  %v1067_v14 = vld [vmem:[%s318_s5 + $0x8] sm:$0xff]  }
  0x7e   : > { %v373_v17 = vld [vmem:[#allocation2 + $0x10] sm:$0xff]  ;;  %v374_v23 = vld [vmem:[#allocation2] sm:$0xff] }
  0x7f   : > { %899 = vmatpush3.bf16.msra.mxu0 %v1059_v6  ;;  %v375_v15 = vld [vmem:[#allocation2 + $0x18] sm:$0xff]  ;;  %v376_v20 = vld [vmem:[#allocation2 + $0x8] sm:$0xff] }
  0x80   : > { %900 = vmatprep.subr.bf16.mxu0 %v1060_v7 }
  0x83   : > { %901 = vmatpush3.bf16.msra.mxu0 %v1060_v7 }
  0x84   : > { %902 = vmatprep.subr.bf16.mxu0 %v1061_v8 }
  0x87   : > { %903 = vmatpush3.bf16.msra.mxu0 %v1061_v8 }
  0x88   : > { %904 = vmatprep.subr.bf16.mxu0 %v1062_v10 }
  0x8b   : > { %905 = vmatpush3.bf16.msra.mxu0 %v1062_v10 }
  0x8c   : > { %906 = vmatprep.subr.bf16.mxu0 %v1063_v11 }
  0x8f   : > { %907 = vmatpush3.bf16.msra.mxu0 %v1063_v11 }
  0x90   : > { %908 = vmatprep.subr.bf16.mxu0 %v1064_v12 }
  0x93   : > { %909 = vmatpush3.bf16.msra.mxu0 %v1064_v12 }
  0x94   : > { %910 = vmatprep.subr.bf16.mxu0 %v1065_v13 }
  0x97   : > { %911 = vmatpush3.bf16.msra.mxu0 %v1065_v13 }
  0x9a   : > { %913 = vmatmul.mubr.bf16.vlgmr.msra.gmra.mxu0 %v1067_v14 }
 0x15a   : > { %v914_v16 = vpop.f32.mrf.mxu0 }
 0x15b   : > { %v508_v18 = vadd.f32 %v914_v16, %v375_v15 }
 0x15c   : > { %v491_v19 = vpop.f32.mrf.mxu0 }
 0x15d   : > { %512 = vst [vmem:[#allocation2 + $0x18] sm:$0xff] %v508_v18  ;;  %v506_v21 = vadd.f32 %v491_v19, %v373_v17 }
 0x15e   : > { %v915_v22 = vpop.f32.mrf.mxu0 }
 0x15f   : > { %510 = vst [vmem:[#allocation2 + $0x10] sm:$0xff] %v506_v21  ;;  %v509_v24 = vadd.f32 %v915_v22, %v376_v20  ;;  %517 = sbr.rel (%p852_p2) target bundleno = 664 (0x298), region = 97 }
 0x160   : > { %v494_v25 = vpop.f32.mrf.mxu0 }
 0x161   : > { %513 = vst [vmem:[#allocation2 + $0x8] sm:$0xff] %v509_v24  ;;  %v507_v26 = vadd.f32 %v494_v25, %v374_v23 }
 0x163   : > { %511 = vst [vmem:[#allocation2] sm:$0xff] %v507_v26 }
 0x164   : > { %v1070_v27 = vld [vmem:[#allocation3] sm:$0xff]   ;;  %v1071_v28 = vld [vmem:[#allocation3 + $0x8] sm:$0xff]   ;;  %v524_v29 = vld [vmem:[#allocation2 + $0x18] sm:$0xff]  ;;  %v1282_v32 = vmov 0   ;;  %vm556_vm0 = vcmask 261120  }
 0x165   : > { %540 = vxpose.xlu0.c.b16.start [1/2] (short) (narrow) %v1070_v27, 32  ;;  %1068 = vset.pattern.permute.xlu1 %v1282_v32  ;;  %v612_v35 = vld [vmem:[%s1670_s3] sm:$0xff]  ;;  %v613_v38 = vld [vmem:[%s1670_s3 + $0x8] sm:$0xff]  ;;  %v615_v40 = vld [vmem:[%s1670_s3 + $0x18] sm:$0xff] }
 0x166   : > { %v522_v31 = vld [vmem:[#allocation2 + $0x10] sm:$0xff]  ;;  %v616_v37 = vmul.f32 0.8, %v612_v35  ;;  %v617_v39 = vmul.f32 0.8, %v613_v38 }
 0x167   : > { %v614_v41 = vld [vmem:[%s1670_s3 + $0x10] sm:$0xff]  ;;  %v619_v42 = vmul.f32 0.8, %v615_v40  ;;  %v857_v49 = vld [vmem:[%s363_s8] ss:$0 sm:$0xff] }
 0x168   : > { %v525_v30 = vld [vmem:[#allocation2 + $0x8] sm:$0xff]  ;;  %623 = vperm.xlu1 %1068, %v616_v37   ;;  %v618_v43 = vmul.f32 0.8, %v614_v41 }
 0x169   : > { %v527_v33 = vpack.c.bf16 %v525_v30, %v524_v29  ;;  %541 = vxpose.xlu0.c.b16.end [2/2] (short) (narrow) %v1071_v28, 32 }
 0x16a   : > { %v523_v34 = vld [vmem:[#allocation2] sm:$0xff] }
 0x16b   : > { %v526_v36 = vpack.c.bf16 %v523_v34, %v522_v31  ;;  %916 = vmatprep.subr.bf16.mxu0 %v527_v33 }
 0x16c   : > { %917 = vmatpush3.bf16.msra.mxu0 %v527_v33  ;;  %628 = vperm.xlu1 %1068, %v617_v39  }
 0x16d   : > { %918 = vmatprep.subr.bf16.mxu0 %v526_v36 }
 0x170   : > { %919 = vmatpush3.bf16.msra.mxu0 %v526_v36  ;;  %638 = vperm.xlu1 %1068, %v619_v42  }
 0x172   : > { %1069 = vset.pattern.permute.xlu0 %v1282_v32 }
 0x173   : > { %633 = vperm.xlu0 %1069, %v618_v43  }
 0x1c7   : > { %v548_v44 = vpop.trf.xlu0 }
 0x1c8   : > { %920 = vmatprep.mubr.msk.bf16.mxu0 %vm556_vm0, %v548_v44 }
 0x1cb   : > { %v549_v45 = vpop.trf.xlu0 }
 0x1cc   : > { %921 = vmatmul.mubr.msk.bf16.vlgmr.msra.gmra.mxu0 %vm556_vm0, %v549_v45 }
 0x1e3   : > { %v624_v46 = vpop.permute.xlu1 %623 }
 0x1e4   : > { %v647_v53 = vmul.f32 %v857_v49, %v624_v46 }
 0x1e6   : > { %v651_v57 = vsub.f32 1.0, %v647_v53 }
 0x1e7   : > { %v629_v47 = vpop.permute.xlu1 %628 }
 0x1e8   : > { %v648_v54 = vmul.f32 %v857_v49, %v629_v47 }
 0x1ea   : > { %v652_v58 = vsub.f32 1.0, %v648_v54 }
 0x1eb   : > { %v639_v50 = vpop.permute.xlu1 %638 }
 0x1ec   : > { %v650_v52 = vmul.f32 %v857_v49, %v639_v50 }
 0x1ee   : > { %v634_v48 = vpop.permute.xlu0 %633  ;;  %v654_v56 = vsub.f32 1.0, %v650_v52 }
 0x1ef   : > { %v649_v51 = vmul.f32 %v857_v49, %v634_v48 }
 0x1f1   : > { %v653_v55 = vsub.f32 1.0, %v649_v51 }
 0x1f3   : > { %1072 = vrcp.f32 %v653_v55 }
 0x1f4   : > { %1074 = vrcp.f32 %v654_v56 }
 0x1f5   : > { %1076 = vrcp.f32 %v651_v57 }
 0x1f6   : > { %1078 = vrcp.f32 %v652_v58 }
 0x200   : > { %v1073_v60 = vpop.eup %1072 }
 0x201   : > { %v1075_v62 = vpop.eup %1074 }
 0x202   : > { %v1077_v0 = vpop.eup %1076 }
 0x203   : > { %v1079_v3 = vpop.eup %1078 }
 0x28c   : > { %v922_v59 = vpop.f32.mrf.mxu0 }
 0x28d   : > { %v665_v1 = vmul.f32 %v1073_v60, %v922_v59 }
 0x28e   : > { %v597_v61 = vpop.f32.mrf.mxu0 }
 0x28f   : > { %v663_v5 = vmul.f32 %v1077_v0, %v597_v61 }
 0x290   : > { %v923_v63 = vpop.f32.mrf.mxu0 }
 0x291   : > { %v666_v2 = vmul.f32 %v1075_v62, %v923_v63 }
 0x292   : > { %v600_v4 = vpop.f32.mrf.mxu0 }
 0x293   : > { %v879_v6 = vpack.c.bf16 %v666_v2, %v665_v1  ;;  %v664_v7 = vmul.f32 %v1079_v3, %v600_v4 }
 0x295   : > { %881 = vst [vmem:[%s1509_s15 + $0x8] sm:$0xff] %v879_v6   ;;  %v874_v8 = vpack.c.bf16 %v664_v7, %v663_v5 }
 0x297   : > { %875 = vst [vmem:[%s1509_s15] sm:$0xff] %v874_v8  }
 0x298 PF: > { %s1671_s5 = sld [smem:[#allocation20_spill]]  ;;  %s863_s18 = sshll.u32 %s1260_s27, 6 }
 0x299   : > { %s1672_s17 = sld [smem:[#allocation25_spill]]  ;;  %s700_s6 = sshll.u32 %s1509_s15, 4  ;;  %s1551_s6 = int_to_ptr.vmem [resolvable:$true] %s700_s6 }
 0x29a   : > { %s1555_s8 = scalar_lea.sflag [#allocation5], %s357_s7  ;;  %s1132_s9 = scalar_lea.vmem %s1551_s6, 256 }
 0x29b   : > { %p1133_p4 = scmp.ne.s32.totalorder %s1551_s6, %s1132_s9  ;;  %s1283_s27 = smov [#allocation9]  }
 0x29c   : > { %s1136_s21 = sshll.u32 %s1283_s27, 4  ;;  %s1137_s21 = int_to_ptr.vmem [resolvable:$false] %s1136_s21 }
 0x29d   : > { %s1138_s12 = scalar_lea.vmem %s1137_s21, 512  ;;  %p1139_p12 = scmp.lt.s32.totalorder %s1551_s6, %s1137_s21 }
 0x29e   : > { %p1673_p6 = scmp.ne.s32.totalorder %s1671_s5, 0  ;;  %p1140_p5 = scmp.lt.s32.totalorder %s1138_s12, %s1132_s9 }
 0x29f   : > { %s1548_s13 = scalar_lea.hbm %s1672_s17, %s863_s18 }
 0x2a0   : > { %p1134_p3 = pnand %p1133_p4, %p1673_p6  ;;  %p1141_p9 = por %p1140_p5, %p1139_p12 }
 0x2a2   : > { %p1135_p7 = pneg %p1134_p3 }
 0x2a4   : > { %p1142_p11 = pnand %p1141_p9, %p1135_p7 }
 0x2a6   : > { %1145 = shalt.err (!%p1142_p11)
}
 0x2a7   : > { %s1146_s7 = scalar_lea.hbm %s1548_s13, 256  ;;  %s1150_s26 = scalar_lea.hbm %s1672_s17, 512 }
 0x2a8   : > { %p1147_p13 = scmp.ne.s32.totalorder %s1548_s13, %s1146_s7  ;;  %p1151_p10 = scmp.lt.s32.totalorder %s1548_s13, %s1672_s17 }
 0x2a9   : > { %p1152_p1 = scmp.lt.s32.totalorder %s1150_s26, %s1146_s7 }
 0x2aa   : > { %p1148_p0 = pnand %p1147_p13, %p1673_p6 }
 0x2ab   : > { %p1153_p2 = por %p1152_p1, %p1151_p10 }
 0x2ac   : > { %p1149_p8 = pneg %p1148_p0 }
 0x2ae   : > { %p1154_p4 = pnand %p1153_p2, %p1149_p8 }
 0x2b0   : > { %1157 = shalt.err (!%p1154_p4)
}
 0x2b1   : > { %s1284_s1 = smov 64   ;;  %s1285_s20 = smov 128  }
 0x2b2   : > { %s1286_s16 = smov 4  }
 0x2b3   : > { %930 = dma.vmem_to_hbm [thread:$0]  (%p1673_p6), %s1551_s6, 256, %s1548_s13, %s1555_s8, %s1284_s1, %s1285_s20, %s1286_s16  }
 0x2b4 PF: > { %s1674_s18 = sld [smem:[#allocation13_spill]]  ;;  %p942_p3 = scmp.ge.s32.totalorder %s1272_s30, 2 }
 0x2b5   : > { %s1675_s11 = sld [smem:[#allocation21_spill]] }
 0x2ba   : > { %s715_s24 = sand.u32 1, %s1674_s18  }
 0x2bb   : > { %p1676_p7 = scmp.ne.s32.totalorder %s1675_s11, 0  ;;  %s716_s9 = scalar_lea.sflag [#allocation5], %s715_s24 }
 0x2bd   : > { %p937_p12 = pnand %p942_p3, %p1676_p7 }
 0x2bf   : > { %p938_p5 = pneg %p937_p12 }
 0x2c1   : > { %1219 = dma.done.wait (%p938_p5), %s716_s9, 256  }
 0x2c2   : > { %1221 = vsyncadd (%p938_p5), %s716_s9, 4294967040  ;;  %s22_s30 = sadd.s32 1, %s1272_s30   ;;  %s1678_s5 = sld [smem:[#allocation14_spill]] }
 0x2c3   : > { %p1583_p9 = scmp.ge.s32.totalorder %s22_s30, 6   ;;  %s1679_s20 = sld [smem:[#allocation19_spill]] }
 0x2c4   : > { %s1680_s13 = sld [smem:[#allocation18_spill]]  ;;  %s1685_s18 = smov %s1228_s19 }
 0x2c5   : > { %s1681_s6 = sld [smem:[#allocation17_spill]]  ;;  %s1687_s21 = smov %s1240_s22 }
 0x2c6   : > { %s1682_s8 = sld [smem:[#allocation15_spill]]  ;;  %s1688_s22 = smov %s1244_s23 }
 0x2c7   : > { %s1683_s12 = sld [smem:[#allocation16_spill]]  ;;  %s1690_s24 = smov %s1252_s25 }
 0x2c8   : > { %s1686_s19 = smov %s1678_s5  ;;  %s1692_s26 = smov %s1264_s28 }
 0x2c9   : > { %s1693_s27 = smov %s1268_s29  ;;  %21 = sbr.rel (!%p1583_p9) target bundleno = 16 (0x10), region = 150 }
 0x2ca   : > { %s1689_s23 = smov %s1680_s13 }
 0x2cb   : > { %s1691_s25 = smov %s1681_s6 }
 0x2cc   : > { %s1694_s28 = smov %s1682_s8 }
 0x2cd   : > { %s1695_s29 = smov %s1683_s12 }
 0x2ce   :  { %721 = vsyncpa [#allocation4], 1 }
 0x2cf   :  { %723 = vsyncpa [#allocation4 + $0x1], 1 }
 0x2d0   :  { %724 = vsyncpa [#allocation8], 1 }
 0x2d1   :  { %726 = vsyncpa [#allocation8 + $0x1], 1 }
 0x2d2   :  { %727 = vsyncpa [#allocation5], 1 }
 0x2d3   :  { %729 = vsyncpa [#allocation5 + $0x1], 1 }

</bundles_post_ra>
